<compile_context>
chip_gen: v6e
topology: v6e:2x2x1
jax: 0.10.0
libtpu: 0.0.40
codegen_flags: <defaults>
</compile_context>

<pallas_src>
import functools

import jax
import jax.numpy as jnp
from jax.experimental import pallas as pl
from jax.experimental.pallas import tpu as pltpu

LANE = 128
_SUBLANE = 8
_TILE_TARGET_BYTES = 2 << 20  # ~2 MiB per row-block tile


# ----------------------------- tiling helpers ------------------------------

def _choose_tile_rows(n_rows: int, lane_width: int, itemsize: int) -> int:
    """Row-block height: ~2 MiB per tile, multiple of 8 sublanes."""
    rows = _TILE_TARGET_BYTES // (lane_width * itemsize)
    rows = max(_SUBLANE, rows - rows % _SUBLANE)
    if rows >= n_rows:
        return n_rows  # whole (small) array in one full-extent block
    return int(rows)


def _resolve_tile_rows(n_rows: int, lane_width: int, itemsize: int,
                       tile_rows: int | None) -> int:
    if tile_rows is None:
        return _choose_tile_rows(n_rows, lane_width, itemsize)
    if tile_rows >= n_rows:
        return n_rows
    return max(_SUBLANE, tile_rows - tile_rows % _SUBLANE)


def _vmem_limit_bytes(tile_bytes: int) -> int:
    # double-buffered in + out tiles + f32 intermediates + headroom,
    # comfortably under v7x's 64 MiB physical VMEM.
    need = 8 * tile_bytes + (8 << 20)
    return int(min(48 << 20, max(need, 16 << 20)))


def _block_diag_mask(d: int) -> jax.Array:
    """(128,128) 0/1 block-diagonal: M[i,j]=1 iff lanes i,j belong to the same packed row."""
    seg = jnp.arange(LANE, dtype=jnp.int32) // d
    return (seg[:, None] == seg[None, :]).astype(jnp.float32)


# -------------------------------- kernels ----------------------------------

def _l2norm_rows_kernel(x_ref, o_ref, *, eps: float):
    x = x_ref[...].astype(jnp.float32)                    # (tile_rows, D)
    ss = jnp.sum(x * x, axis=-1, keepdims=True)           # (tile_rows, 1)
    eps2 = jnp.float32(eps * eps)
    inv = jax.lax.rsqrt(jnp.maximum(ss, eps2))            # EUP rsqrt (frees VALU)
    o_ref[...] = (x * inv).astype(o_ref.dtype)


def _l2norm_packed_kernel(x_ref, m_ref, o_ref, *, eps: float):
    x = x_ref[...].astype(jnp.float32)                    # (tile_rows, 128)
    # Per-segment sum of squares via one MXU matmul against the block-diagonal
    # 0/1 mask: every lane ends up holding the sum for its own packed row.
    seg = jnp.dot(x * x, m_ref[...], preferred_element_type=jnp.float32)
    eps2 = jnp.float32(eps * eps)
    inv = jax.lax.rsqrt(jnp.maximum(seg, eps2))
    o_ref[...] = (x * inv).astype(o_ref.dtype)


# -------------------------------- wrappers ----------------------------------

def _l2_normalize_rows(x: jax.Array, eps: float, tile_rows: int | None) -> jax.Array:
    n, d = x.shape
    pad_d = (-d) % LANE
    if pad_d:
        x = jnp.pad(x, ((0, 0), (0, pad_d)))   # zero lanes don't change the norm
    dp = x.shape[1]
    itemsize = x.dtype.itemsize

    tr = _resolve_tile_rows(n, dp, itemsize, tile_rows)
    pad_n = (-n) % tr
    if pad_n:
        x = jnp.pad(x, ((0, pad_n), (0, 0)))   # zero rows normalize to zero rows
    n_p = x.shape[0]
    tile_bytes = tr * dp * itemsize
    # TODO(synk): add a second grid axis over D (two-pass reduce-then-scale) if a
    # single (tile_rows, D) block ever exceeds the VMEM budget for very large D.

    out = pl.pallas_call(
        functools.partial(_l2norm_rows_kernel, eps=eps),
        out_shape=jax.ShapeDtypeStruct((n_p, dp), x.dtype),
        grid_spec=pl.GridSpec(
            grid=(n_p // tr,),
            in_specs=[pl.BlockSpec((tr, dp), lambda i: (i, 0))],
            out_specs=pl.BlockSpec((tr, dp), lambda i: (i, 0)),
        ),
        compiler_params=pltpu.CompilerParams(
            dimension_semantics=("parallel",),
            vmem_limit_bytes=_vmem_limit_bytes(tile_bytes),
        ),
        cost_estimate=pl.CostEstimate(
            flops=3 * n_p * dp,
            transcendentals=n_p,
            bytes_accessed=2 * n_p * dp * itemsize,
        ),
    )(x)
    return out[:n, :d]


def _l2_normalize_packed(x: jax.Array, eps: float, tile_rows: int | None) -> jax.Array:
    n, d = x.shape
    group = LANE // d                          # rows packed per 128-lane vreg row
    pad_rows = (-n) % group
    if pad_rows:
        x = jnp.pad(x, ((0, pad_rows), (0, 0)))
    n_rows = x.shape[0] // group
    xp = x.reshape(n_rows, LANE)               # lane-dense layout
    itemsize = x.dtype.itemsize

    tr = _resolve_tile_rows(n_rows, LANE, itemsize, tile_rows)
    pad_tiles = (-n_rows) % tr
    if pad_tiles:
        xp = jnp.pad(xp, ((0, pad_tiles), (0, 0)))
    n_rows_p = xp.shape[0]
    tile_bytes = tr * LANE * itemsize

    out = pl.pallas_call(
        functools.partial(_l2norm_packed_kernel, eps=eps),
        out_shape=jax.ShapeDtypeStruct((n_rows_p, LANE), x.dtype),
        grid_spec=pl.GridSpec(
            grid=(n_rows_p // tr,),
            in_specs=[
                pl.BlockSpec((tr, LANE), lambda i: (i, 0)),
                pl.BlockSpec((LANE, LANE), lambda i: (0, 0)),  # resident 64 KiB mask
            ],
            out_specs=pl.BlockSpec((tr, LANE), lambda i: (i, 0)),
        ),
        compiler_params=pltpu.CompilerParams(
            dimension_semantics=("parallel",),
            vmem_limit_bytes=_vmem_limit_bytes(tile_bytes),
        ),
        cost_estimate=pl.CostEstimate(
            flops=2 * n_rows_p * LANE * LANE + 3 * n_rows_p * LANE,
            transcendentals=n_rows_p * LANE,
            bytes_accessed=2 * n_rows_p * LANE * itemsize,
        ),
    )(xp, _block_diag_mask(d))
    return out.reshape(-1, d)[:n]


def l2_normalize(x: jax.Array, eps: float = 1e-12,
                 tile_rows: int | None = None) -> jax.Array:
    """F.normalize(x, p=2, dim=1, eps) for x of shape (N, D), normalized axis last."""
    assert x.ndim == 2, "expects (N, D) with the normalized axis last (torch dim=1)"
    _, d = x.shape
    if d < LANE and LANE % d == 0:
        return _l2_normalize_packed(x, eps, tile_rows)
    return _l2_normalize_rows(x, eps, tile_rows)


def _reference(x: jax.Array, eps: float = 1e-12) -> jax.Array:
    norm = jnp.sqrt(jnp.sum(x.astype(jnp.float32) ** 2, axis=1, keepdims=True))
    return (x / jnp.maximum(norm, eps)).astype(x.dtype)


if __name__ == "__main__":
    key = jax.random.PRNGKey(0)
    k1, k2, k3 = jax.random.split(key, 3)

    # 1) Encoder embedding shape: batch=8 rows, hidden=32 (small-D lane-packed MXU path).
    x_small = jax.random.normal(k1, (8, 32), dtype=jnp.float32)
    out_small = jax.block_until_ready(l2_normalize(x_small, eps=1e-12))
    assert jnp.allclose(out_small, _reference(x_small), atol=1e-5, rtol=1e-5), "packed path mismatch"

    # 2) Wider feature dim (multiple of 128) exercises the generic row-wise path.
    x_wide = jax.random.normal(k2, (5, 384), dtype=jnp.float32)
    out_wide = jax.block_until_ready(l2_normalize(x_wide, eps=1e-12))
    assert jnp.allclose(out_wide, _reference(x_wide), atol=1e-5, rtol=1e-5), "row path mismatch"

    # 3) Multi-step pipelined grid + row padding (N not a multiple of the tile).
    x_mid = jax.random.normal(k3, (50, 256), dtype=jnp.float32)
    out_mid = jax.block_until_ready(l2_normalize(x_mid, eps=1e-12, tile_rows=16))
    assert jnp.allclose(out_mid, _reference(x_mid), atol=1e-5, rtol=1e-5), "tiled path mismatch"

    print("KERNEL_OK")
</pallas_src>

<mosaic_0001>
module attributes {stable_mosaic.version = 11 : i64} {
  func.func @_l2norm_packed_kernel(%arg0: i32, %arg1: memref<2x128xf32, #tpu.memory_space<vmem>>, %arg2: memref<128x128xf32, #tpu.memory_space<vmem>>, %arg3: memref<2x128xf32, #tpu.memory_space<vmem>>) attributes {dimension_semantics = [#tpu.dimension_semantics<parallel>], iteration_bounds = array<i64: 1>, scalar_prefetch = 0 : i64, scratch_operands = 0 : i64, tpu.core_type = #tpu.core_type<tc>, window_params = [{transform_indices = @transform_0, window_bounds = array<i64: 2, 128>}, {pipeline_mode = #tpu.pipeline_mode<synchronous>, transform_indices = @transform_1, window_bounds = array<i64: 128, 128>}, {transform_indices = @transform_2, window_bounds = array<i64: 2, 128>}]} {
    %c0 = arith.constant 0 : index
    %c0_0 = arith.constant 0 : index
    %0 = vector.load %arg1[%c0, %c0_0] : memref<2x128xf32, #tpu.memory_space<vmem>>, vector<2x128xf32>
    %1 = arith.mulf %0, %0 : vector<2x128xf32>
    %c0_1 = arith.constant 0 : index
    %c0_2 = arith.constant 0 : index
    %2 = vector.load %arg2[%c0_1, %c0_2] : memref<128x128xf32, #tpu.memory_space<vmem>>, vector<128x128xf32>
    %cst = arith.constant dense<0.000000e+00> : vector<2x128xf32>
    %3 = tpu.matmul %1, %2, %cst {dimension_numbers = #tpu.dot_dimension_numbers<[1], [0], [0], [1], [0, 0, 1, 1], [], []>} : vector<2x128xf32>, vector<128x128xf32>, vector<2x128xf32> -> vector<2x128xf32>
    %cst_3 = arith.constant 1.000000e-24 : f32
    %4 = vector.broadcast %cst_3 : f32 to vector<2x128xf32>
    %5 = arith.maximumf %3, %4 : vector<2x128xf32>
    %6 = math.rsqrt %5 : vector<2x128xf32>
    %7 = arith.mulf %0, %6 : vector<2x128xf32>
    %c0_4 = arith.constant 0 : index
    %c0_5 = arith.constant 0 : index
    %8 = vector.load %arg3[%c0_4, %c0_5] : memref<2x128xf32, #tpu.memory_space<vmem>>, vector<2x128xf32>
    tpu.vector_store %arg3[%c0_4, %c0_5], %7 {strides = array<i32>} : memref<2x128xf32, #tpu.memory_space<vmem>>, vector<2x128xf32>,
    return
  }
  func.func @transform_0(%arg0: i32) -> (i32, i32) {
    %c0_i32 = arith.constant 0 : i32
    %c0_i32_0 = arith.constant 0 : i32
    return %arg0, %c0_i32 : i32, i32
  }
  func.func @transform_1(%arg0: i32) -> (i32, i32) {
    %c0_i32 = arith.constant 0 : i32
    %c0_i32_0 = arith.constant 0 : i32
    %c0_i32_1 = arith.constant 0 : i32
    return %c0_i32, %c0_i32_0 : i32, i32
  }
  func.func @transform_2(%arg0: i32) -> (i32, i32) {
    %c0_i32 = arith.constant 0 : i32
    %c0_i32_0 = arith.constant 0 : i32
    return %arg0, %c0_i32 : i32, i32
  }
}

</mosaic_0001>

<bundles_post_ra>
// kernel: tpu_custom_call.1
= control target key start
LH: loop header
LB: loop body
LE: loop exit
PB: predicated region body
PF: predicated region fallthrough
CT: control target
= control target key end

     0   :  { %7 = vsyncpa [#allocation3], 0  ;;  %s304_s0 = inlined_call_operand.hbm [shape: f32[2,128], index: 0, kind: input, shape index: {}]   ;;  %s305_s1 = inlined_call_operand.hbm [shape: f32[128,128], index: 1, kind: input, shape index: {}]   ;;  %s306_s2 = inlined_call_operand.hbm [shape: f32[2,128], index: 2, kind: output, shape index: {}]  }
   0x1   :  { %8 = vsyncpa [#allocation6], 0 }
   0x2   :  { %9 = vsyncpa [#allocation4], 0  ;;  %s273_s9 = smov [#allocation2]   ;;  %s274_s11 = smov [#allocation5]  }
   0x3   :  { %s16_s10 = sshll.u32 %s273_s9, 4  ;;  %s25_s12 = sshll.u32 %s274_s11, 4  ;;  %s17_s10 = int_to_ptr.vmem [resolvable:$true] %s16_s10  ;;  %s26_s12 = int_to_ptr.vmem [resolvable:$true] %s25_s12 }
   0x4   :  { %s215_s13 = scalar_lea.vmem %s17_s10, 32  ;;  %p220_p1 = scmp.lt.s32.totalorder %s17_s10, %s17_s10 }
   0x5   :  { %p216_p0 = scmp.ne.s32.totalorder %s17_s10, %s215_s13  ;;  %p221_p2 = scmp.lt.s32.totalorder %s215_s13, %s215_s13 }
   0x7   :  { %p222_p3 = por %p221_p2, %p220_p1 }
   0x9   :  { %p223_p4 = pnand %p222_p3, %p216_p0 }
   0xb   :  { %226 = shalt.err (!%p223_p4)
}
   0xc   :  { %19 = dma.hbm_to_vmem [thread:$0]  %s304_s0, 32, %s17_s10, [#allocation3]  }
   0xd   :  { %s235_s16 = scalar_lea.vmem %s26_s12, 2048  ;;  %p240_p6 = scmp.lt.s32.totalorder %s26_s12, %s26_s12 }
   0xe   :  { %p236_p5 = scmp.ne.s32.totalorder %s26_s12, %s235_s16  ;;  %p241_p7 = scmp.lt.s32.totalorder %s235_s16, %s235_s16 }
  0x10   :  { %p242_p8 = por %p241_p7, %p240_p6 }
  0x12   :  { %p243_p9 = pnand %p242_p8, %p236_p5 }
  0x14   :  { %246 = shalt.err (!%p243_p9)
}
  0x15   :  { %s275_s17 = smov 128   ;;  %s276_s18 = smov 8  }
  0x16   :  { %31 = dma.hbm_to_vmem [thread:$0]  %s305_s1, 2048, %s26_s12, [#allocation6], %s275_s17, %s275_s17, %s276_s18  }
  0x17   :  { %267 = dma.done.wait [#allocation3], 32  }
  0x18   :  { %268 = vsyncadd [#allocation3], 4294967264 }
  0x19   :  { %269 = dma.done.wait [#allocation6], 2048  }
  0x1a   :  { %270 = vsyncadd [#allocation6], 4294965248  ;;  %v277_v0 = vmov 0.0   ;;  %vm278_vm0 = vmmov 0   ;;  %v55_v1 = vld [vmem:[#allocation5 + $0x78] sm:$0xff]  ;;  %v54_v2 = vld [vmem:[#allocation5 + $0x70] sm:$0xff] }
  0x1b   :  { %163 = vmatprep.subr.mxu0 %v277_v0  ;;  %195 = vmatprep.mubr.msk.f32.mxu0 %vm278_vm0, %v277_v0  ;;  %v53_v3 = vld [vmem:[#allocation5 + $0x68] sm:$0xff]  ;;  %v52_v4 = vld [vmem:[#allocation5 + $0x60] sm:$0xff]  ;;  %v51_v5 = vld [vmem:[#allocation5 + $0x58] sm:$0xff]  ;;  %s279_s0 = smov [#allocation7]  }
  0x1c   :  { %164 = vmatpush3.msra.mxu0 %v55_v1  ;;  %v50_v6 = vld [vmem:[#allocation5 + $0x50] sm:$0xff]  ;;  %v49_v7 = vld [vmem:[#allocation5 + $0x48] sm:$0xff]  ;;  %v48_v8 = vld [vmem:[#allocation5 + $0x40] sm:$0xff]  ;;  %s136_s1 = sshll.u32 %s279_s0, 4  ;;  %s137_s1 = int_to_ptr.vmem [resolvable:$true] %s136_s1 }
  0x1d   :  { %165 = vmatprep.subr.mxu0 %v277_v0  ;;  %v47_v9 = vld [vmem:[#allocation5 + $0x38] sm:$0xff]  ;;  %v46_v10 = vld [vmem:[#allocation5 + $0x30] sm:$0xff]  ;;  %v45_v11 = vld [vmem:[#allocation5 + $0x28] sm:$0xff]  ;;  %s247_s21 = scalar_lea.vmem %s137_s1, 32  ;;  %p252_p11 = scmp.lt.s32.totalorder %s137_s1, %s137_s1 }
  0x1e   :  { %166 = vmatpush3.msra.mxu0 %v54_v2  ;;  %v44_v12 = vld [vmem:[#allocation5 + $0x20] sm:$0xff]  ;;  %v43_v13 = vld [vmem:[#allocation5 + $0x18] sm:$0xff]  ;;  %v42_v14 = vld [vmem:[#allocation5 + $0x10] sm:$0xff]  ;;  %p248_p10 = scmp.ne.s32.totalorder %s137_s1, %s247_s21  ;;  %p253_p12 = scmp.lt.s32.totalorder %s247_s21, %s247_s21 }
  0x1f   :  { %167 = vmatprep.subr.mxu0 %v277_v0  ;;  %v38_v15 = vld [vmem:[#allocation2] sm:$0x3]  ;;  %v41_v16 = vld [vmem:[#allocation5 + $0x8] sm:$0xff]  ;;  %v40_v17 = vld [vmem:[#allocation5] sm:$0xff] }
  0x20   :  { %168 = vmatpush3.msra.mxu0 %v53_v3  ;;  %v39_v18 = vmul.f32 %v38_v15, %v38_v15  ;;  %p254_p13 = por %p253_p12, %p252_p11 }
  0x21   :  { %169 = vmatprep.subr.mxu0 %v277_v0 }
  0x22   :  { %170 = vmatpush3.msra.mxu0 %v52_v4  ;;  %p255_p0 = pnand %p254_p13, %p248_p10 }
  0x23   :  { %171 = vmatprep.subr.mxu0 %v277_v0 }
  0x24   :  { %172 = vmatpush3.msra.mxu0 %v51_v5 }
  0x25   :  { %173 = vmatprep.subr.mxu0 %v277_v0 }
  0x26   :  { %174 = vmatpush3.msra.mxu0 %v50_v6 }
  0x27   :  { %175 = vmatprep.subr.mxu0 %v277_v0 }
  0x28   :  { %176 = vmatpush3.msra.mxu0 %v49_v7 }
  0x29   :  { %177 = vmatprep.subr.mxu0 %v277_v0 }
  0x2a   :  { %178 = vmatpush3.msra.mxu0 %v48_v8 }
  0x2b   :  { %179 = vmatprep.subr.mxu0 %v277_v0 }
  0x2c   :  { %180 = vmatpush3.msra.mxu0 %v47_v9 }
  0x2d   :  { %181 = vmatprep.subr.mxu0 %v277_v0 }
  0x2e   :  { %182 = vmatpush3.msra.mxu0 %v46_v10 }
  0x2f   :  { %183 = vmatprep.subr.mxu0 %v277_v0 }
  0x30   :  { %184 = vmatpush3.msra.mxu0 %v45_v11 }
  0x31   :  { %185 = vmatprep.subr.mxu0 %v277_v0 }
  0x32   :  { %186 = vmatpush3.msra.mxu0 %v44_v12 }
  0x33   :  { %187 = vmatprep.subr.mxu0 %v277_v0 }
  0x34   :  { %188 = vmatpush3.msra.mxu0 %v43_v13 }
  0x35   :  { %189 = vmatprep.subr.mxu0 %v277_v0 }
  0x36   :  { %190 = vmatpush3.msra.mxu0 %v42_v14 }
  0x37   :  { %191 = vmatprep.subr.mxu0 %v277_v0 }
  0x38   :  { %192 = vmatpush3.msra.mxu0 %v41_v16 }
  0x39   :  { %193 = vmatprep.subr.mxu0 %v277_v0 }
  0x3a   :  { %194 = vmatpush3.msra.mxu0 %v40_v17 }
  0x3b   :  { %196 = vmatmul.mubr.f32.vlgmr.msra.gmra.mxu0 %v39_v18 }
  0xfb   :  { %v122_v19 = vpop.f32.mrf.mxu0 }
  0xfc   :  { %v126_v20 = vmax.f32 %v122_v19, 1e-24 }
  0xfd   :  { %v197_v21 = vpop.f32.mrf.mxu0 }
  0xfe   :  { %205 = vrsqrt.f32 %v126_v20 }
 0x10b   :  { %v206_v22 = vpop.eup %205 }
 0x10c   :  { %v128_v23 = vmul.f32 %v206_v22, %v38_v15 }
 0x10e   :  { %129 = vst [vmem:[#allocation7] sm:$0x3] %v128_v23 }
 0x10f   :  { %258 = shalt.err (!%p255_p0)
}
 0x110   :  { %139 = dma.vmem_to_hbm [thread:$0]  %s137_s1, 32, %s306_s2, [#allocation4]  }
 0x111   :  { %271 = dma.done.wait [#allocation4], 32  }
 0x112   :  { %272 = vsyncadd [#allocation4], 4294967264 }
 0x113   :  { %143 = vsyncpa [#allocation3], 1 }
 0x114   :  { %144 = vsyncpa [#allocation6], 1 }
 0x115   :  { %145 = vsyncpa [#allocation4], 1 }

</bundles_post_ra>
